<compile_context>
chip_gen: v5e
topology: v5e:2x2
jax: 0.10.0
libtpu: 0.0.40
codegen_flags: <defaults>
</compile_context>

<pallas_src>
import functools

import jax
import jax.numpy as jnp
from jax.experimental import pallas as pl
from jax.experimental.pallas import tpu as pltpu


def _softmax_rows(m):
    """Row softmax with max-subtraction; multiply-by-reciprocal (exact)."""
    mx = jnp.max(m, axis=-1, keepdims=True)
    e = jnp.exp(m - mx)
    s = jnp.sum(e, axis=-1, keepdims=True)
    return e * pl.reciprocal(s)


# ----------------------------------------------------------------------------
# Fused kernel: encode -> normalize -> affinities -> palindrome walk -> row NLL
# ----------------------------------------------------------------------------
def _crw_kernel(x_ref, w_ref, b_ref, a_ref, loss_ref, *, T, N, inv_tau):
    # x_ref:    (T*N, P)   flattened patches for one batch element
    # w_ref:    (P, C)     encoder projection
    # b_ref:    (1, C)     encoder bias
    # a_ref:    (T-1, N, N) output affinities A[t] = E_t E_{t+1}^T / tau
    # loss_ref: (1, N)      per-row NLL summed over all walk lengths k
    x = x_ref[...]
    w = w_ref[...]
    b = b_ref[...]

    # --- encoder: single (T*N, P) x (P, C) GEMM on the MXU -------------------
    e = jnp.dot(x, w, preferred_element_type=jnp.float32) + b
    # F.normalize(dim=-1): x / max(||x||, 1e-12) == x * rsqrt(max(||x||^2, 1e-24))
    sumsq = jnp.sum(e * e, axis=-1, keepdims=True)
    e = e * jax.lax.rsqrt(jnp.maximum(sumsq, 1e-24))

    # --- affinities: one Gram matmul, slice (t, t+1) off-diagonal blocks -----
    g = jax.lax.dot_general(
        e, e,
        dimension_numbers=(((1,), (1,)), ((), ())),
        preferred_element_type=jnp.float32,
    )                                              # (T*N, T*N)
    a_blocks = []
    for t in range(T - 1):                         # static, unrolled
        a_t = g[t * N:(t + 1) * N, (t + 1) * N:(t + 2) * N] * inv_tau
        a_ref[t, :, :] = a_t
        a_blocks.append(a_t)

    # --- palindrome random walk + per-row NLL --------------------------------
    rows = jax.lax.broadcasted_iota(jnp.int32, (N, N), 0)
    cols = jax.lax.broadcasted_iota(jnp.int32, (N, N), 1)
    eye = (rows == cols).astype(jnp.float32)

    acc = jnp.zeros((N, 1), dtype=jnp.float32)

    if T > 2:
        # Softmaxes hoisted out of the k-loop (walk only ever touches A[0..T-3]):
        #   forward steps use softmax(A[t]), backward steps softmax(A[t]^T).
        p_bwd = [_softmax_rows(jnp.transpose(a_blocks[t])) for t in range(T - 2)]
        p_fwd = [None] + [_softmax_rows(a_blocks[t]) for t in range(1, T - 2)]

        # At_k = [softmax(A0^T) .. softmax(A_{k-1}^T)] @ [softmax(A_{k-1}) .. softmax(A1)]
        # maintained incrementally as bwd_k @ fwd_k.
        fwd = eye                  # empty forward product
        bwd = p_bwd[0]
        for k in range(1, T - 1):  # static, unrolled
            if k >= 2:
                fwd = jnp.dot(p_fwd[k - 1], fwd, preferred_element_type=jnp.float32)
                bwd = jnp.dot(bwd, p_bwd[k - 1], preferred_element_type=jnp.float32)
                at = jnp.dot(bwd, fwd, preferred_element_type=jnp.float32)
            else:
                at = bwd

            # cross_entropy(At^T, I) per row j: logsumexp(At[j,:]) - At[j,j]
            m2 = jnp.max(at, axis=-1, keepdims=True)
            lse = m2 + jnp.log(jnp.sum(jnp.exp(at - m2), axis=-1, keepdims=True))
            diag = jnp.sum(at * eye, axis=-1, keepdims=True)
            acc = acc + (lse - diag)

    loss_ref[...] = jnp.transpose(acc)             # lane-dense (1, N) store


def crw_fused(x, w, b, tau):
    # x: (B, T, N, P) f32, w: (P, C), b: (1, C)
    # returns A: (B, T-1, N, N), rowloss: (B, 1, N)
    B, T, N, P = x.shape
    C = w.shape[1]
    x2 = x.reshape(B, T * N, P)
    kernel = functools.partial(_crw_kernel, T=T, N=N, inv_tau=1.0 / tau)
    return pl.pallas_call(
        kernel,
        out_shape=(
            jax.ShapeDtypeStruct((B, T - 1, N, N), jnp.float32),
            jax.ShapeDtypeStruct((B, 1, N), jnp.float32),
        ),
        grid=(B,),
        in_specs=[
            pl.BlockSpec((None, T * N, P), lambda i: (i, 0, 0)),
            pl.BlockSpec((P, C), lambda i: (0, 0)),
            pl.BlockSpec((1, C), lambda i: (0, 0)),
        ],
        out_specs=(
            pl.BlockSpec((None, T - 1, N, N), lambda i: (i, 0, 0, 0)),
            pl.BlockSpec((None, 1, N), lambda i: (i, 0, 0)),
        ),
        compiler_params=pltpu.CompilerParams(dimension_semantics=("parallel",)),
    )(x2, w, b)


# ----------------------------------------------------------------------------
# Full forward (glue in plain JAX)
# ----------------------------------------------------------------------------
def crw_forward(seq, w_enc, b_enc, tau, only_a=False):
    B, T, N, H, W = seq.shape
    x = seq.reshape(B, T, N, H * W)
    A, rowloss = crw_fused(x, w_enc, b_enc, tau)
    if only_a:
        return A
    # cross_entropy mean over (B, N) per k, summed over k, then final /N
    loss = rowloss.sum() / (B * N) / N
    return loss, A


# ----------------------------------------------------------------------------
# Pure-JAX reference (for correctness check)
# ----------------------------------------------------------------------------
def crw_reference(seq, w_enc, b_enc, tau):
    B, T, N, H, W = seq.shape
    hi = jax.lax.Precision.HIGHEST
    x = seq.reshape(B, T, N, H * W)
    emb = jnp.einsum("btnp,pc->btnc", x, w_enc, precision=hi) + b_enc.reshape(1, 1, 1, -1)
    nrm = jnp.sqrt(jnp.sum(emb * emb, axis=-1, keepdims=True))
    emb = emb / jnp.maximum(nrm, 1e-12)
    A = jnp.einsum("btnc,btmc->btnm", emb[:, :-1], emb[:, 1:], precision=hi) / tau
    loss = jnp.float32(0.0)
    for k in range(1, T - 1):
        At = jnp.broadcast_to(jnp.eye(N, dtype=jnp.float32), (B, N, N))
        for t in range(1, 2 * k):
            if t < k:
                M = A[:, t]
            else:
                M = jnp.transpose(A[:, 2 * k - 1 - t], (0, 2, 1))
            Pm = jax.nn.softmax(M, axis=-1)
            At = jnp.einsum("bij,bjk->bik", Pm, At, precision=hi)
        lse = jax.scipy.special.logsumexp(At, axis=-1)       # (B, N)
        diag = jnp.diagonal(At, axis1=1, axis2=2)            # (B, N)
        loss = loss + jnp.mean(lse - diag)
    return loss / N, A


if __name__ == "__main__":
    B, T, N, H, W = 2, 4, 8, 8, 8
    C = 32
    tau = 0.07

    key = jax.random.PRNGKey(0)
    k1, k2, k3 = jax.random.split(key, 3)
    seq = jax.random.normal(k1, (B, T, N, H, W), dtype=jnp.float32)
    w_enc = jax.random.normal(k2, (H * W, C), dtype=jnp.float32) * 0.05
    b_enc = jax.random.normal(k3, (1, C), dtype=jnp.float32) * 0.01

    loss, A = crw_forward(seq, w_enc, b_enc, tau)
    (loss, A) = jax.block_until_ready((loss, A))

    loss_ref, A_ref = crw_reference(seq, w_enc, b_enc, tau)
    assert A.shape == (B, T - 1, N, N)
    assert jnp.allclose(A, A_ref, atol=1e-3, rtol=1e-3), "affinity mismatch"
    assert jnp.allclose(loss, loss_ref, atol=1e-3, rtol=1e-3), "loss mismatch"

    print("KERNEL_OK")
</pallas_src>

<mosaic_0001>
module attributes {stable_mosaic.version = 11 : i64} {
  func.func @_crw_kernel(%arg0: i32, %arg1: memref<1x32x64xf32, #tpu.memory_space<vmem>>, %arg2: memref<64x32xf32, #tpu.memory_space<vmem>>, %arg3: memref<1x32xf32, #tpu.memory_space<vmem>>, %arg4: memref<1x3x8x8xf32, #tpu.memory_space<vmem>>, %arg5: memref<1x1x8xf32, #tpu.memory_space<vmem>>) attributes {dimension_semantics = [#tpu.dimension_semantics<parallel>], iteration_bounds = array<i64: 2>, scalar_prefetch = 0 : i64, scratch_operands = 0 : i64, tpu.core_type = #tpu.core_type<tc>, window_params = [{transform_indices = @transform_0, window_bounds = array<i64: 1, 32, 64>}, {pipeline_mode = #tpu.pipeline_mode<synchronous>, transform_indices = @transform_1, window_bounds = array<i64: 64, 32>}, {pipeline_mode = #tpu.pipeline_mode<synchronous>, transform_indices = @transform_2, window_bounds = array<i64: 1, 32>}, {transform_indices = @transform_3, window_bounds = array<i64: 1, 3, 8, 8>}, {transform_indices = @transform_4, window_bounds = array<i64: 1, 1, 8>}]} {
    %c0 = arith.constant 0 : index
    %c0_0 = arith.constant 0 : index
    %c0_1 = arith.constant 0 : index
    %0 = vector.load %arg1[%c0, %c0_0, %c0_1] : memref<1x32x64xf32, #tpu.memory_space<vmem>>, vector<1x32x64xf32>
    %1 = vector.shape_cast %0 : vector<1x32x64xf32> to vector<32x64xf32>
    %c0_2 = arith.constant 0 : index
    %c0_3 = arith.constant 0 : index
    %2 = vector.load %arg2[%c0_2, %c0_3] : memref<64x32xf32, #tpu.memory_space<vmem>>, vector<64x32xf32>
    %c0_4 = arith.constant 0 : index
    %c0_5 = arith.constant 0 : index
    %3 = vector.load %arg3[%c0_4, %c0_5] : memref<1x32xf32, #tpu.memory_space<vmem>>, vector<1x32xf32>
    %cst = arith.constant dense<0.000000e+00> : vector<32x32xf32>
    %4 = tpu.matmul %1, %2, %cst {dimension_numbers = #tpu.dot_dimension_numbers<[1], [0], [0], [1], [0, 0, 1, 1], [], []>} : vector<32x64xf32>, vector<64x32xf32>, vector<32x32xf32> -> vector<32x32xf32>
    %5 = vector.broadcast %3 : vector<1x32xf32> to vector<32x32xf32>
    %6 = arith.addf %4, %5 : vector<32x32xf32>
    %7 = arith.mulf %6, %6 : vector<32x32xf32>
    %cst_6 = arith.constant dense<0.000000e+00> : vector<32xf32>
    %8 = vector.multi_reduction <add>, %7, %cst_6 [1] : vector<32x32xf32> to vector<32xf32>
    %9 = vector.shape_cast %8 : vector<32xf32> to vector<32x1xf32>
    %cst_7 = arith.constant 1.000000e-24 : f32
    %10 = vector.broadcast %cst_7 : f32 to vector<32x1xf32>
    %11 = arith.maximumf %9, %10 : vector<32x1xf32>
    %12 = math.rsqrt %11 : vector<32x1xf32>
    %13 = vector.broadcast %12 : vector<32x1xf32> to vector<32x32xf32>
    %14 = arith.mulf %6, %13 : vector<32x32xf32>
    %cst_8 = arith.constant dense<0.000000e+00> : vector<32x32xf32>
    %15 = tpu.matmul %14, %14, %cst_8 {dimension_numbers = #tpu.dot_dimension_numbers<[1], [1], [0], [0], [0, 0, 1, 0], [], []>} : vector<32x32xf32>, vector<32x32xf32>, vector<32x32xf32> -> vector<32x32xf32>
    %16 = vector.extract_strided_slice %15 {offsets = [0, 8], sizes = [8, 8], strides = [1, 1]} : vector<32x32xf32> to vector<8x8xf32>
    %cst_9 = arith.constant 14.2857141 : f32
    %17 = vector.broadcast %cst_9 : f32 to vector<8x8xf32>
    %18 = arith.mulf %16, %17 : vector<8x8xf32>
    %c0_10 = arith.constant 0 : index
    %c0_11 = arith.constant 0 : index
    %c0_12 = arith.constant 0 : index
    %c0_13 = arith.constant 0 : index
    %19 = vector.load %arg4[%c0_10, %c0_11, %c0_12, %c0_13] : memref<1x3x8x8xf32, #tpu.memory_space<vmem>>, vector<1x1x8x8xf32>
    %20 = vector.shape_cast %19 : vector<1x1x8x8xf32> to vector<8x8xf32>
    %21 = vector.shape_cast %18 : vector<8x8xf32> to vector<1x1x8x8xf32>
    tpu.vector_store %arg4[%c0_10, %c0_11, %c0_12, %c0_13], %21 {strides = array<i32>} : memref<1x3x8x8xf32, #tpu.memory_space<vmem>>, vector<1x1x8x8xf32>,
    %22 = vector.extract_strided_slice %15 {offsets = [8, 16], sizes = [8, 8], strides = [1, 1]} : vector<32x32xf32> to vector<8x8xf32>
    %cst_14 = arith.constant 14.2857141 : f32
    %23 = vector.broadcast %cst_14 : f32 to vector<8x8xf32>
    %24 = arith.mulf %22, %23 : vector<8x8xf32>
    %c0_15 = arith.constant 0 : index
    %c1 = arith.constant 1 : index
    %c0_16 = arith.constant 0 : index
    %c0_17 = arith.constant 0 : index
    %25 = vector.load %arg4[%c0_15, %c1, %c0_16, %c0_17] : memref<1x3x8x8xf32, #tpu.memory_space<vmem>>, vector<1x1x8x8xf32>
    %26 = vector.shape_cast %25 : vector<1x1x8x8xf32> to vector<8x8xf32>
    %27 = vector.shape_cast %24 : vector<8x8xf32> to vector<1x1x8x8xf32>
    tpu.vector_store %arg4[%c0_15, %c1, %c0_16, %c0_17], %27 {strides = array<i32>} : memref<1x3x8x8xf32, #tpu.memory_space<vmem>>, vector<1x1x8x8xf32>,
    %28 = vector.extract_strided_slice %15 {offsets = [16, 24], sizes = [8, 8], strides = [1, 1]} : vector<32x32xf32> to vector<8x8xf32>
    %cst_18 = arith.constant 14.2857141 : f32
    %29 = vector.broadcast %cst_18 : f32 to vector<8x8xf32>
    %30 = arith.mulf %28, %29 : vector<8x8xf32>
    %c0_19 = arith.constant 0 : index
    %c2 = arith.constant 2 : index
    %c0_20 = arith.constant 0 : index
    %c0_21 = arith.constant 0 : index
    %31 = vector.load %arg4[%c0_19, %c2, %c0_20, %c0_21] : memref<1x3x8x8xf32, #tpu.memory_space<vmem>>, vector<1x1x8x8xf32>
    %32 = vector.shape_cast %31 : vector<1x1x8x8xf32> to vector<8x8xf32>
    %33 = vector.shape_cast %30 : vector<8x8xf32> to vector<1x1x8x8xf32>
    tpu.vector_store %arg4[%c0_19, %c2, %c0_20, %c0_21], %33 {strides = array<i32>} : memref<1x3x8x8xf32, #tpu.memory_space<vmem>>, vector<1x1x8x8xf32>,
    %34 = tpu.iota {dimensions = array<i32: 0>} : vector<8x8xi32>
    %35 = tpu.iota {dimensions = array<i32: 1>} : vector<8x8xi32>
    %36 = arith.cmpi eq, %34, %35 : vector<8x8xi32>
    %37 = arith.extui %36 : vector<8x8xi1> to vector<8x8xi32>
    %38 = arith.sitofp %37 : vector<8x8xi32> to vector<8x8xf32>
    %cst_22 = arith.constant 0.000000e+00 : f32
    %39 = vector.broadcast %cst_22 : f32 to vector<8x1xf32>
    %40 = tpu.transpose %18, [1, 0] : vector<8x8xf32> -> vector<8x8xf32>
    %cst_23 = arith.constant dense<0xFF800000> : vector<8xf32>
    %41 = vector.multi_reduction <maximumf>, %40, %cst_23 [1] : vector<8x8xf32> to vector<8xf32>
    %42 = vector.shape_cast %41 : vector<8xf32> to vector<8x1xf32>
    %43 = vector.broadcast %42 : vector<8x1xf32> to vector<8x8xf32>
    %44 = arith.subf %40, %43 : vector<8x8xf32>
    %45 = math.exp %44 : vector<8x8xf32>
    %cst_24 = arith.constant dense<0.000000e+00> : vector<8xf32>
    %46 = vector.multi_reduction <add>, %45, %cst_24 [1] : vector<8x8xf32> to vector<8xf32>
    %47 = vector.shape_cast %46 : vector<8xf32> to vector<8x1xf32>
    %48 = tpu.reciprocal %47 : vector<8x1xf32> -> vector<8x1xf32>
    %49 = vector.broadcast %48 : vector<8x1xf32> to vector<8x8xf32>
    %50 = arith.mulf %45, %49 : vector<8x8xf32>
    %51 = tpu.transpose %24, [1, 0] : vector<8x8xf32> -> vector<8x8xf32>
    %cst_25 = arith.constant dense<0xFF800000> : vector<8xf32>
    %52 = vector.multi_reduction <maximumf>, %51, %cst_25 [1] : vector<8x8xf32> to vector<8xf32>
    %53 = vector.shape_cast %52 : vector<8xf32> to vector<8x1xf32>
    %54 = vector.broadcast %53 : vector<8x1xf32> to vector<8x8xf32>
    %55 = arith.subf %51, %54 : vector<8x8xf32>
    %56 = math.exp %55 : vector<8x8xf32>
    %cst_26 = arith.constant dense<0.000000e+00> : vector<8xf32>
    %57 = vector.multi_reduction <add>, %56, %cst_26 [1] : vector<8x8xf32> to vector<8xf32>
    %58 = vector.shape_cast %57 : vector<8xf32> to vector<8x1xf32>
    %59 = tpu.reciprocal %58 : vector<8x1xf32> -> vector<8x1xf32>
    %60 = vector.broadcast %59 : vector<8x1xf32> to vector<8x8xf32>
    %61 = arith.mulf %56, %60 : vector<8x8xf32>
    %cst_27 = arith.constant dense<0xFF800000> : vector<8xf32>
    %62 = vector.multi_reduction <maximumf>, %24, %cst_27 [1] : vector<8x8xf32> to vector<8xf32>
    %63 = vector.shape_cast %62 : vector<8xf32> to vector<8x1xf32>
    %64 = vector.broadcast %63 : vector<8x1xf32> to vector<8x8xf32>
    %65 = arith.subf %24, %64 : vector<8x8xf32>
    %66 = math.exp %65 : vector<8x8xf32>
    %cst_28 = arith.constant dense<0.000000e+00> : vector<8xf32>
    %67 = vector.multi_reduction <add>, %66, %cst_28 [1] : vector<8x8xf32> to vector<8xf32>
    %68 = vector.shape_cast %67 : vector<8xf32> to vector<8x1xf32>
    %69 = tpu.reciprocal %68 : vector<8x1xf32> -> vector<8x1xf32>
    %70 = vector.broadcast %69 : vector<8x1xf32> to vector<8x8xf32>
    %71 = arith.mulf %66, %70 : vector<8x8xf32>
    %cst_29 = arith.constant dense<0xFF800000> : vector<8xf32>
    %72 = vector.multi_reduction <maximumf>, %50, %cst_29 [1] : vector<8x8xf32> to vector<8xf32>
    %73 = vector.shape_cast %72 : vector<8xf32> to vector<8x1xf32>
    %74 = vector.broadcast %73 : vector<8x1xf32> to vector<8x8xf32>
    %75 = arith.subf %50, %74 : vector<8x8xf32>
    %76 = math.exp %75 : vector<8x8xf32>
    %cst_30 = arith.constant dense<0.000000e+00> : vector<8xf32>
    %77 = vector.multi_reduction <add>, %76, %cst_30 [1] : vector<8x8xf32> to vector<8xf32>
    %78 = vector.shape_cast %77 : vector<8xf32> to vector<8x1xf32>
    %79 = math.log %78 : vector<8x1xf32>
    %80 = arith.addf %73, %79 : vector<8x1xf32>
    %81 = arith.mulf %50, %38 : vector<8x8xf32>
    %cst_31 = arith.constant dense<0.000000e+00> : vector<8xf32>
    %82 = vector.multi_reduction <add>, %81, %cst_31 [1] : vector<8x8xf32> to vector<8xf32>
    %83 = vector.shape_cast %82 : vector<8xf32> to vector<8x1xf32>
    %84 = arith.subf %80, %83 : vector<8x1xf32>
    %85 = arith.addf %39, %84 : vector<8x1xf32>
    %cst_32 = arith.constant dense<0.000000e+00> : vector<8x8xf32>
    %86 = tpu.matmul %71, %38, %cst_32 {dimension_numbers = #tpu.dot_dimension_numbers<[1], [0], [0], [1], [0, 0, 1, 1], [], []>} : vector<8x8xf32>, vector<8x8xf32>, vector<8x8xf32> -> vector<8x8xf32>
    %cst_33 = arith.constant dense<0.000000e+00> : vector<8x8xf32>
    %87 = tpu.matmul %50, %61, %cst_33 {dimension_numbers = #tpu.dot_dimension_numbers<[1], [0], [0], [1], [0, 0, 1, 1], [], []>} : vector<8x8xf32>, vector<8x8xf32>, vector<8x8xf32> -> vector<8x8xf32>
    %cst_34 = arith.constant dense<0.000000e+00> : vector<8x8xf32>
    %88 = tpu.matmul %87, %86, %cst_34 {dimension_numbers = #tpu.dot_dimension_numbers<[1], [0], [0], [1], [0, 0, 1, 1], [], []>} : vector<8x8xf32>, vector<8x8xf32>, vector<8x8xf32> -> vector<8x8xf32>
    %cst_35 = arith.constant dense<0xFF800000> : vector<8xf32>
    %89 = vector.multi_reduction <maximumf>, %88, %cst_35 [1] : vector<8x8xf32> to vector<8xf32>
    %90 = vector.shape_cast %89 : vector<8xf32> to vector<8x1xf32>
    %91 = vector.broadcast %90 : vector<8x1xf32> to vector<8x8xf32>
    %92 = arith.subf %88, %91 : vector<8x8xf32>
    %93 = math.exp %92 : vector<8x8xf32>
    %cst_36 = arith.constant dense<0.000000e+00> : vector<8xf32>
    %94 = vector.multi_reduction <add>, %93, %cst_36 [1] : vector<8x8xf32> to vector<8xf32>
    %95 = vector.shape_cast %94 : vector<8xf32> to vector<8x1xf32>
    %96 = math.log %95 : vector<8x1xf32>
    %97 = arith.addf %90, %96 : vector<8x1xf32>
    %98 = arith.mulf %88, %38 : vector<8x8xf32>
    %cst_37 = arith.constant dense<0.000000e+00> : vector<8xf32>
    %99 = vector.multi_reduction <add>, %98, %cst_37 [1] : vector<8x8xf32> to vector<8xf32>
    %100 = vector.shape_cast %99 : vector<8xf32> to vector<8x1xf32>
    %101 = arith.subf %97, %100 : vector<8x1xf32>
    %102 = arith.addf %85, %101 : vector<8x1xf32>
    %103 = tpu.transpose %102, [1, 0] : vector<8x1xf32> -> vector<1x8xf32>
    %c0_38 = arith.constant 0 : index
    %c0_39 = arith.constant 0 : index
    %c0_40 = arith.constant 0 : index
    %104 = vector.load %arg5[%c0_38, %c0_39, %c0_40] : memref<1x1x8xf32, #tpu.memory_space<vmem>>, vector<1x1x8xf32>
    %105 = vector.shape_cast %104 : vector<1x1x8xf32> to vector<1x8xf32>
    %106 = vector.shape_cast %103 : vector<1x8xf32> to vector<1x1x8xf32>
    tpu.vector_store %arg5[%c0_38, %c0_39, %c0_40], %106 {strides = array<i32>} : memref<1x1x8xf32, #tpu.memory_space<vmem>>, vector<1x1x8xf32>,
    return
  }
  func.func @transform_0(%arg0: i32) -> (i32, i32, i32) {
    %c0_i32 = arith.constant 0 : i32
    %c0_i32_0 = arith.constant 0 : i32
    %c0_i32_1 = arith.constant 0 : i32
    return %arg0, %c0_i32, %c0_i32_0 : i32, i32, i32
  }
  func.func @transform_1(%arg0: i32) -> (i32, i32) {
    %c0_i32 = arith.constant 0 : i32
    %c0_i32_0 = arith.constant 0 : i32
    %c0_i32_1 = arith.constant 0 : i32
    return %c0_i32, %c0_i32_0 : i32, i32
  }
  func.func @transform_2(%arg0: i32) -> (i32, i32) {
    %c0_i32 = arith.constant 0 : i32
    %c0_i32_0 = arith.constant 0 : i32
    %c0_i32_1 = arith.constant 0 : i32
    return %c0_i32, %c0_i32_0 : i32, i32
  }
  func.func @transform_3(%arg0: i32) -> (i32, i32, i32, i32) {
    %c0_i32 = arith.constant 0 : i32
    %c0_i32_0 = arith.constant 0 : i32
    %c0_i32_1 = arith.constant 0 : i32
    %c0_i32_2 = arith.constant 0 : i32
    return %arg0, %c0_i32, %c0_i32_0, %c0_i32_1 : i32, i32, i32, i32
  }
  func.func @transform_4(%arg0: i32) -> (i32, i32, i32) {
    %c0_i32 = arith.constant 0 : i32
    %c0_i32_0 = arith.constant 0 : i32
    %c0_i32_1 = arith.constant 0 : i32
    return %arg0, %c0_i32, %c0_i32_0 : i32, i32, i32
  }
}

</mosaic_0001>

<bundles_post_ra>
// kernel: tpu_custom_call.1
= control target key start
LH: loop header
LB: loop body
LE: loop exit
PB: predicated region body
PF: predicated region fallthrough
CT: control target
= control target key end

     0   :  { %10 = vsyncpa [#allocation3], 0  ;;  %s1239_s0 = inlined_call_operand.vmem [shape: f32[2,32,64], index: 0, kind: input, shape index: {}]   ;;  %s1240_s1 = inlined_call_operand.vmem [shape: f32[64,32], index: 1, kind: input, shape index: {}]   ;;  %s1241_s2 = inlined_call_operand.vmem [shape: f32[1,32], index: 2, kind: input, shape index: {}]   ;;  %s1242_s3 = inlined_call_operand.hbm [shape: f32[2,3,8,8], index: 3, kind: output, shape index: {0}]   ;;  %s1243_s4 = inlined_call_operand.hbm [shape: f32[2,1,8], index: 4, kind: output, shape index: {1}]  }
   0x1   :  { %12 = vsyncpa [#allocation3 + $0x1], 0 }
   0x2   :  { %13 = vsyncpa [#allocation5], 0 }
   0x3   :  { %15 = vsyncpa [#allocation5 + $0x1], 0  ;;  %s1053_s15 = smov 0   ;;  %s1055_s16 = smov 0  }
   0x4   :  { %s1057_s17 = smov 0   ;;  %s1059_s18 = smov 0  }
   0x5 LB: > { %s1074_s19 = sadd.s32 4294967295, %s1019_s18   ;;  %s802_s20 = sadd.s32 4294967294, %s1019_s18   ;;  %s1019_s18 = sphi %s1059_s18, %s1249_s18   ;;  %s1015_s17 = sphi %s1057_s17, %s1248_s17   ;;  %s1011_s16 = sphi %s1055_s16, %s1247_s16   ;;  %s1007_s15 = sphi %s1053_s15, %s1246_s15  }
   0x6   : > { %s1078_s21 = sadd.s32 1, %s1019_s18   ;;  %s96_s22 = sadd.s32 1, %s1015_s17 }
   0x7   : > { %s93_s23 = ssub.s32 %s1019_s18, %s1078_s21  ;;  %p106_p0 = scmp.ne.s32.totalorder %s1015_s17, %s1011_s16 }
   0x8   : > { %p94_p1 = scmp.eq.s32.totalorder %s93_s23, 0  ;;  %p107_p2 = scmp.eq.s32.totalorder %s1074_s19, 1 }
   0x9   : > { %p112_p3 = scmp.ne.s32.totalorder %s1011_s16, %s1007_s15  ;;  %p113_p4 = scmp.eq.s32.totalorder %s802_s20, 1 }
   0xa   : > { %s1089_s24 = scalar_select %p94_p1, %s1015_s17, %s96_s22  }
   0xb   : > { %p1091_p5 = por %p107_p2, %p106_p0  ;;  %p1095_p6 = por %p113_p4, %p112_p3 }
   0xc   : > { %p805_p7 = scmp.ge.s32.totalorder %s1019_s18, 1  ;;  %p171_p8 = scmp.lt.s32.totalorder %s1019_s18, 3 }
   0xe   : > { %p172_p9 = pnand %p805_p7, %p171_p8 }
   0xf   : > { %p201_p10 = scmp.lt.s32.totalorder (!%p172_p9), %s1074_s19, 1  ;;  %s1022_s8 = smov (!%p172_p9), 112  }
  0x10   : > { %175 = sbr.rel (%p172_p9) target bundleno = 1711 (0x6af), region = 32  ;;  %s1161_s9 = sand.u32 (!%p172_p9), 1, %s1011_s16  }
  0x11   : > { %s843_s10 = smul.u32 (!%p172_p9), 24, %s1161_s9 }
  0x12   : > { %s844_s14 = smul.u32 (!%p172_p9), 24, %s1074_s19 }
  0x13   : > { %s1164_s11 = scalar_lea.vmem (!%p172_p9), [#allocation2], %s843_s10 }
  0x14   : > { %s696_s13 = sshll.u32 (!%p172_p9), %s1164_s11, 4  ;;  %s695_s23 = scalar_lea.hbm (!%p172_p9), %s1242_s3, %s844_s14  ;;  %s697_s13 = int_to_ptr.vmem [resolvable:$true] %s696_s13 }
  0x15   : > { %v217_v0 = vld [vmem:[%s1240_s1 + $0x38] sm:$0xff]  ;;  %v216_v1 = vld [vmem:[%s1240_s1 + $0x30] sm:$0xff]  ;;  %v215_v2 = vld [vmem:[%s1240_s1 + $0x28] sm:$0xff]  ;;  %s202_s7 = scalar_select %p201_p10, %s1074_s19, 1  ;;  %vm222_vm0 = vcmask 523264   ;;  %vm268_vm1 = vcmask 261120  }
  0x16   : > { %243 = vmatpush.msra.mxu0 %v217_v0  ;;  %831 = vmatpush.msra.mxu3 %v217_v0  ;;  %v214_v3 = vld [vmem:[%s1240_s1 + $0x20] sm:$0xff]  ;;  %v213_v4 = vld [vmem:[%s1240_s1 + $0x18] sm:$0xff]  ;;  %v212_v5 = vld [vmem:[%s1240_s1 + $0x10] sm:$0xff]  ;;  %vm509_vm14 = vcmask 195712   ;;  %vm374_vm15 = vcmask 64512   ;;  %s698_s27 = sshll.u32 %s695_s23, 4  ;;  %s699_s27 = int_to_ptr.hbm [resolvable:$true] %s698_s27 }
  0x17   : > { %s830_s12 = sshll.u32 %s202_s7, 5  ;;  %v211_v6 = vld [vmem:[%s1240_s1 + $0x8] sm:$0xff]  ;;  %v210_v7 = vld [vmem:[%s1240_s1] sm:$0xff]  ;;  %s1021_s7 = smov 120  }
  0x18   : > { %244 = vmatpush.msra.mxu0 %v216_v1  ;;  %832 = vmatpush.msra.mxu3 %v216_v1  ;;  %s205_s28 = scalar_lea.vmem %s1239_s0, %s830_s12  ;;  %v896_v13 = vld [vmem:[%s1241_s2] ss:$0 sm:$0xff]  ;;  %s1025_s12 = smov 104  }
  0x19   : > { %v206_v8 = vld [vmem:[%s205_s28] sm:$0xff]  ;;  %v209_v9 = vld [vmem:[%s205_s28 + $0x18] sm:$0xff]  ;;  %v207_v10 = vld [vmem:[%s205_s28 + $0x8] sm:$0xff]  ;;  %s939_s29 = sshra.s32 %s699_s27, 4  ;;  %s940_s29 = int_to_ptr.hbm [resolvable:$true] %s939_s29 }
  0x1a   : > { %245 = vmatpush.msra.mxu0 %v215_v2  ;;  %833 = vmatpush.msra.mxu3 %v215_v2  ;;  %v208_v11 = vld [vmem:[%s205_s28 + $0x10] sm:$0xff]  ;;  %s680_s28 = scalar_lea.sflag [#allocation3], %s1161_s9  ;;  %s941_s30 = scalar_lea.hbm %s940_s29, 24 }
  0x1b   : > { %p942_p11 = scmp.ne.s32.totalorder %s940_s29, %s941_s30  ;;  %p946_p0 = scmp.lt.s32.totalorder %s940_s29, %s1242_s3 }
  0x1c   : > { %246 = vmatpush.msra.mxu0 %v214_v3  ;;  %834 = vmatpush.msra.mxu3 %v214_v3 }
  0x1d   : > { %p943_p12 = pnand %p942_p11, %p1091_p5 }
  0x1e   : > { %247 = vmatpush.msra.mxu0 %v213_v4  ;;  %835 = vmatpush.msra.mxu3 %v213_v4 }
  0x1f   : > { %p944_p13 = pneg %p943_p12 }
  0x20   : > { %248 = vmatpush.msra.mxu0 %v212_v5  ;;  %836 = vmatpush.msra.mxu3 %v212_v5 }
  0x22   : > { %249 = vmatpush.msra.mxu0 %v211_v6  ;;  %837 = vmatpush.msra.mxu3 %v211_v6 }
  0x24   : > { %250 = vmatpush.msra.mxu0 %v210_v7  ;;  %838 = vmatpush.msra.mxu3 %v210_v7 }
  0x25   : > { %808 = vmatmul.msk.f32.vlgmr.msra.gmra.mxu0 %vm222_vm0, %v206_v8  ;;  %811 = vmatmul.msk.f32.vlgmr.msra.gmra.mxu3 %vm222_vm0, %v209_v9 }
  0x2d   : > { %809 = vmatmul.msk.f32.gmra.mxu0 %vm222_vm0, %v207_v10 }
  0x35   : > { %810 = vmatmul.msk.f32.gmra.mxu0 %vm222_vm0, %v208_v11 }
  0xa2   : > { %v252_v12 = vpop.f32.mrf.mxu0 }
  0xa3   : > { %v1138_v21 = vadd.f32 %v896_v13, %v252_v12 }
  0xa5   : > { %v264_v25 = vmul.f32 %v1138_v21, %v1138_v21 }
  0xa7   : > { %v269_v28 = vsel %vm268_vm1, %v264_v25, 0.0 }
  0xa8   : > { %v261_v14 = vpop.f32.mrf.mxu3 }
  0xa9   : > { %v262_v15 = vadd.f32 %v896_v13, %v261_v14 }
  0xaa   : > { %v255_v16 = vpop.f32.mrf.mxu0 }
  0xab   : > { %v1133_v17 = vadd.f32 %v896_v13, %v255_v16  ;;  %v267_v18 = vmul.f32 %v262_v15, %v262_v15 }
  0xad   : > { %v278_v19 = vsel %vm268_vm1, %v267_v18, 0.0  ;;  %v265_v20 = vmul.f32 %v1133_v17, %v1133_v17 }
  0xae   : > { %279 = vadd.xlane.f32.xlu0 %v278_v19 }
  0xaf   : > { %v272_v22 = vsel %vm268_vm1, %v265_v20, 0.0 }
  0xb0   : > { %273 = vadd.xlane.f32.xlu1 %v272_v22 }
  0xb2   : > { %v258_v23 = vpop.f32.mrf.mxu0 }
  0xb3   : > { %v259_v24 = vadd.f32 %v896_v13, %v258_v23 }
  0xb5   : > { %v266_v26 = vmul.f32 %v259_v24, %v259_v24 }
  0xb7   : > { %v275_v27 = vsel %vm268_vm1, %v266_v26, 0.0 }
  0xb8   : > { %276 = vadd.xlane.f32.xlu0 %v275_v27  ;;  %270 = vadd.xlane.f32.xlu1 %v269_v28 }
 0x121   : > { %v280_v29 = vpop.xlane.xlu0 %279 }
 0x122   : > { %v284_v30 = vmax.f32 %v280_v29, 1e-24 }
 0x123   : > { %v274_v31 = vpop.xlane.xlu1 %273 }
 0x124   : > { %897 = vrsqrt.f32 %v284_v30  ;;  %v282_v32 = vmax.f32 %v274_v31, 1e-24  ;;  %vm321_vm3 = vweird.f32 %v284_v30 }
 0x126   : > { %899 = vrsqrt.f32 %v282_v32  ;;  %vm301_vm9 = vweird.f32 %v282_v32 }
 0x12a   : > { %v898_v33 = vpop.eup %897 }
 0x12b   : > { %v316_v34 = vmul.f32 %v898_v33, %v284_v30  ;;  %v277_v35 = vpop.xlane.xlu0 %276  ;;  %v271_v36 = vpop.xlane.xlu1 %270  ;;  %vm322_vm2 = vweird.f32 %v898_v33 }
 0x12c   : > { %v900_v37 = vpop.eup %899  ;;  %v283_v38 = vmax.f32 %v277_v35, 1e-24  ;;  %v281_v39 = vmax.f32 %v271_v36, 1e-24  ;;  %vm323_vm4 = vmor %vm321_vm3, %vm322_vm2 }
 0x12d   : > { %v317_v40 = vmul.f32 %v898_v33, %v316_v34  ;;  %v296_v41 = vmul.f32 %v900_v37, %v282_v32  ;;  %vm302_vm6 = vweird.f32 %v900_v37 }
 0x12e   : > { %901 = vrsqrt.f32 %v283_v38  ;;  %vm311_vm7 = vweird.f32 %v283_v38  ;;  %vm303_vm10 = vmor %vm301_vm9, %vm302_vm6  ;;  %vm291_vm12 = vweird.f32 %v281_v39 }
 0x12f   : > { %v318_v42 = vmul.f32 0.5, %v317_v40  ;;  %903 = vrsqrt.f32 %v281_v39  ;;  %v297_v44 = vmul.f32 %v900_v37, %v296_v41 }
 0x131   : > { %v319_v43 = vsub.f32 1.5, %v318_v42  ;;  %v298_v48 = vmul.f32 0.5, %v297_v44 }
 0x133   : > { %v320_v45 = vmul.f32 %v898_v33, %v319_v43  ;;  %v299_v55 = vsub.f32 1.5, %v298_v48  ;;  %v1023_v48 = vmov 1.0  }
 0x134   : > { %v902_v46 = vpop.eup %901 }
 0x135   : > { %v904_v47 = vpop.eup %903  ;;  %v306_v49 = vmul.f32 %v902_v46, %v283_v38  ;;  %v324_v50 = vsel %vm323_vm4, %v898_v33, %v320_v45  ;;  %vm312_vm5 = vweird.f32 %v902_v46  ;;  %v300_v61 = vmul.f32 %v900_v37, %v299_v55 }
 0x136   : > { %v286_v51 = vmul.f32 %v904_v47, %v281_v39  ;;  %v328_v52 = vmul.f32 %v324_v50, %v262_v15  ;;  %vm313_vm8 = vmor %vm311_vm7, %vm312_vm5  ;;  %vm292_vm11 = vweird.f32 %v904_v47  ;;  %v390_v45 = vlaneseq }
 0x137   : > { %v307_v53 = vmul.f32 %v902_v46, %v306_v49  ;;  %v304_v0 = vsel %vm303_vm10, %v900_v37, %v300_v61  ;;  %vm293_vm13 = vmor %vm291_vm12, %vm292_vm11 }
 0x138   : > { %v287_v54 = vmul.f32 %v904_v47, %v286_v51  ;;  %812 = vmatpush.xpose.msk.msra.mxu1 %vm268_vm1, %v328_v52  ;;  %839 = vmatpush.xpose.msk.msra.mxu2 %vm268_vm1, %v328_v52  ;;  %v326_v2 = vmul.f32 %v304_v0, %v1133_v17 }
 0x139   : > { %v308_v56 = vmul.f32 0.5, %v307_v53 }
 0x13a   : > { %v288_v57 = vmul.f32 0.5, %v287_v54 }
 0x13b   : > { %v309_v58 = vsub.f32 1.5, %v308_v56 }
 0x13c   : > { %v289_v59 = vsub.f32 1.5, %v288_v57 }
 0x13d   : > { %v310_v60 = vmul.f32 %v902_v46, %v309_v58 }
 0x13e   : > { %v290_v1 = vmul.f32 %v904_v47, %v289_v59 }
 0x13f   : > { %v314_v62 = vsel %vm313_vm8, %v902_v46, %v310_v60  ;;  %v391_v46 = vshrl.u32 %v390_v45, 7 }
 0x140   : > { %v327_v63 = vmul.f32 %v314_v62, %v259_v24  ;;  %v294_v3 = vsel %vm293_vm13, %v904_v47, %v290_v1  ;;  %v393_v47 = vand.u32 127, %v390_v45 }
 0x141   : > { %v325_v4 = vmul.f32 %v294_v3, %v1138_v21 }
 0x142   : > { %813 = vmatpush.xpose.msk.msra.mxu1 %vm268_vm1, %v327_v63  ;;  %840 = vmatpush.xpose.msk.msra.mxu2 %vm268_vm1, %v327_v63  ;;  %vm394_vm4 = vcmp.eq.s32.totalorder %v391_v46, %v393_v47 }
 0x146   : > { %814 = vmatpush.xpose.msk.msra.mxu1 %vm268_vm1, %v326_v2  ;;  %841 = vmatpush.xpose.msk.msra.mxu2 %vm268_vm1, %v326_v2 }
 0x14a   : > { %815 = vmatpush.xpose.msk.msra.mxu1 %vm268_vm1, %v325_v4  ;;  %842 = vmatpush.xpose.msk.msra.mxu2 %vm268_vm1, %v325_v4 }
 0x14d   : > { %816 = vmatmul.msk.f32.vlgmr.msra.gmra.mxu1 %vm268_vm1, %v325_v4  ;;  %819 = vmatmul.msk.f32.vlgmr.msra.gmra.mxu2 %vm268_vm1, %v328_v52 }
 0x14e   : > { %823 = vmatpush.msk.msrb.mxu2 %vm394_vm4, %v1023_v48 }
 0x155   : > { %817 = vmatmul.msk.f32.gmra.mxu1 %vm268_vm1, %v326_v2 }
 0x15d   : > { %818 = vmatmul.msk.f32.gmra.mxu1 %vm268_vm1, %v327_v63 }
 0x1ca   : > { %v358_v5 = vpop.f32.mrf.mxu1 }
 0x1cb   : > { %v369_v6 = vmul.f32 14.285714, %v358_v5 }
 0x1cd   : > { %371 = vrot.lane.b32.xlu0 %v369_v6, %s1021_s7  ;;  %s945_s7 = scalar_lea.hbm %s1242_s3, 48 }
 0x1ce   : > { %p947_p1 = scmp.lt.s32.totalorder %s945_s7, %s941_s30 }
 0x1d0   : > { %v367_v7 = vpop.f32.mrf.mxu2  ;;  %p948_p2 = por %p947_p1, %p946_p0 }
 0x1d2   : > { %v361_v8 = vpop.f32.mrf.mxu1  ;;  %p949_p3 = pnand %p948_p2, %p944_p13 }
 0x1d3   : > { %v376_v9 = vmul.f32 14.285714, %v361_v8 }
 0x1d5   : > { %378 = vrot.lane.b32.xlu2 %v376_v9, %s1022_s8  ;;  %v510_v10 = vsel %vm509_vm14, %v376_v9, -inf }
 0x1fe   : > { %511 = vmax.xlane.f32.xlu2 %v510_v10 }
 0x22f   : > { %v379_v11 = vpop.permute.xlu2 %378 }
 0x230   : > { %820 = vst.msk [vmem:[%s1164_s11 + $0x8] sm:$0xff] %vm374_vm15, %v379_v11  ;;  %453 = vxpose.xlu2.b32.start.end [1/1] (short) (narrow) %v379_v11, 8 }
 0x23f   : > { %v372_v12 = vpop.permute.xlu0 %371 }
 0x240   : > { %375 = vst.msk [vmem:[%s1164_s11] sm:$0xff] %vm374_vm15, %v372_v12  ;;  %397 = vxpose.xlu0.b32.start.end [1/1] (short) (narrow) %v372_v12, 8 }
 0x271   : > { %v512_v13 = vpop.xlane.xlu2 %511 }
 0x272   : > { %v513_v14 = vsub.f32 %v376_v9, %v512_v13 }
 0x274   : > { %v514_v15 = vmul.f32 1.442695, %v513_v14 }
 0x276   : > { %905 = vpow2.f32 %v514_v15 }
 0x27c   : > { %v906_v16 = vpop.eup %905 }
 0x27d   : > { %517 = vrot.lane.b32.xlu1 %v906_v16, %s1022_s8 }
 0x2c9   : > { %v469_v17 = vpop.trf.xlu2 }
 0x2ca   : > { %v485_v18 = vsel %vm374_vm15, %v469_v17, -inf }
 0x2cb   : > { %486 = vmax.xlane.f32.xlu1 %v485_v18 }
 0x2e4   : > { %v413_v19 = vpop.trf.xlu0 }
 0x2e5   : > { %v429_v20 = vsel %vm374_vm15, %v413_v19, -inf }
 0x2e6   : > { %430 = vmax.xlane.f32.xlu0 %v429_v20 }
 0x2ef   : > { %v518_v21 = vpop.permute.xlu1 %517 }
 0x2f0   : > { %v520_v22 = vsel %vm374_vm15, %v518_v21, 0.0 }
 0x2f1   : > { %521 = vadd.xlane.f32.xlu2 %v520_v22 }
 0x33e   : > { %v487_v23 = vpop.xlane.xlu1 %486 }
 0x33f   : > { %v488_v26 = vsub.f32 %v469_v17, %v487_v23 }
 0x341   : > { %v489_v28 = vmul.f32 1.442695, %v488_v26 }
 0x359   : > { %v431_v24 = vpop.xlane.xlu0 %430 }
 0x35a   : > { %v432_v25 = vsub.f32 %v413_v19, %v431_v24  ;;  %v364_v24 = vpop.f32.mrf.mxu1 }
 0x35c   : > { %v433_v27 = vmul.f32 1.442695, %v432_v25  ;;  %v383_v25 = vmul.f32 14.285714, %v364_v24 }
 0x35e   : > { %907 = vpow2.f32 %v433_v27 }
 0x35f   : > { %909 = vpow2.f32 %v489_v28 }
 0x364   : > { %v908_v29 = vpop.eup %907  ;;  %v522_v30 = vpop.xlane.xlu2 %521 }
 0x365   : > { %v435_v31 = vsel %vm374_vm15, %v908_v29, 0.0  ;;  %911 = vrcp.f32 %v522_v30  ;;  %v910_v32 = vpop.eup %909  ;;  %v534_v39 = vand.u32 2147483648, %v522_v30  ;;  %vm528_vm1 = vweird.f32 %v522_v30 }
 0x366   : > { %436 = vadd.xlane.f32.xlu1 %v435_v31  ;;  %v491_v34 = vsel %vm374_vm15, %v910_v32, 0.0  ;;  %v532_v40 = vand.u32 2147483647, %v522_v30 }
 0x367   : > { %v535_v42 = vor.u32 1.1754944e-38, %v534_v39 }
 0x368   : > { %vm533_vm3 = vcmp.eq.f32.partialorder %v532_v40, 8.507059e+37 }
 0x36b   : > { %v912_v33 = vpop.eup %911 }
 0x36c   : > { %v524_v35 = vmul.f32 %v912_v33, %v522_v30  ;;  %vm529_vm0 = vweird.f32 %v912_v33 }
 0x36d   : > { %vm530_vm2 = vmor %vm528_vm1, %vm529_vm0 }
 0x36e   : > { %492 = vadd.xlane.f32.xlu1 %v491_v34  ;;  %v525_v36 = vsub.f32 1.0, %v524_v35 }
 0x370   : > { %v526_v37 = vmul.f32 %v912_v33, %v525_v36 }
 0x372   : > { %v527_v38 = vadd.f32 %v912_v33, %v526_v37 }
 0x374   : > { %v531_v41 = vsel %vm530_vm2, %v912_v33, %v527_v38 }
 0x375   : > { %v536_v43 = vsel %vm533_vm3, %v535_v42, %v531_v41 }
 0x376   : > { %v537_v44 = vmul.f32 %v906_v16, %v536_v43  ;;  %v1024_v16 = vmov 0.0  }
 0x377   : > { %v822_v17 = vsel %vm394_vm4, 1.0, %v1024_v16 }
 0x387   : > { %557 = vrot.lane.b32.xlu1 %v537_v44, %s1022_s8 }
 0x3d9   : > { %v437_v49 = vpop.xlane.xlu1 %436 }
 0x3da   : > { %913 = vrcp.f32 %v437_v49  ;;  %v449_v54 = vand.u32 2147483648, %v437_v49  ;;  %v447_v56 = vand.u32 2147483647, %v437_v49  ;;  %vm443_vm6 = vweird.f32 %v437_v49 }
 0x3dc   : > { %v450_v59 = vor.u32 1.1754944e-38, %v449_v54  ;;  %vm448_vm8 = vcmp.eq.f32.partialorder %v447_v56, 8.507059e+37 }
 0x3e0   : > { %v914_v50 = vpop.eup %913 }
 0x3e1   : > { %v439_v51 = vmul.f32 %v914_v50, %v437_v49  ;;  %v493_v52 = vpop.xlane.xlu1 %492  ;;  %vm444_vm5 = vweird.f32 %v914_v50 }
 0x3e2   : > { %915 = vrcp.f32 %v493_v52  ;;  %vm445_vm7 = vmor %vm443_vm6, %vm444_vm5  ;;  %v505_v1 = vand.u32 2147483648, %v493_v52  ;;  %v503_v4 = vand.u32 2147483647, %v493_v52  ;;  %vm499_vm10 = vweird.f32 %v493_v52 }
 0x3e3   : > { %v440_v53 = vsub.f32 1.0, %v439_v51 }
 0x3e4   : > { %v506_v6 = vor.u32 1.1754944e-38, %v505_v1  ;;  %vm504_vm12 = vcmp.eq.f32.partialorder %v503_v4, 8.507059e+37 }
 0x3e5   : > { %v441_v55 = vmul.f32 %v914_v50, %v440_v53 }
 0x3e7   : > { %v442_v57 = vadd.f32 %v914_v50, %v441_v55 }
 0x3e8   : > { %v916_v58 = vpop.eup %915 }
 0x3e9   : > { %v495_v60 = vmul.f32 %v916_v58, %v493_v52  ;;  %v446_v61 = vsel %vm445_vm7, %v914_v50, %v442_v57  ;;  %vm500_vm9 = vweird.f32 %v916_v58 }
 0x3ea   : > { %v451_v62 = vsel %vm448_vm8, %v450_v59, %v446_v61  ;;  %vm501_vm11 = vmor %vm499_vm10, %vm500_vm9 }
 0x3eb   : > { %v496_v63 = vsub.f32 1.0, %v495_v60  ;;  %v452_v0 = vmul.f32 %v908_v29, %v451_v62 }
 0x3ed   : > { %v497_v2 = vmul.f32 %v916_v58, %v496_v63  ;;  %v538_v3 = vsel %vm374_vm15, %v452_v0, -inf  ;;  %v550_v18 = vmul.f32 %v822_v17, %v452_v0 }
 0x3ee   : > { %539 = vmax.xlane.f32.xlu1 %v538_v3 }
 0x3ef   : > { %v498_v5 = vadd.f32 %v916_v58, %v497_v2  ;;  %v551_v19 = vsel %vm374_vm15, %v550_v18, 0.0 }
 0x3f1   : > { %v502_v7 = vsel %vm501_vm11, %v916_v58, %v498_v5 }
 0x3f2   : > { %v507_v8 = vsel %vm504_vm12, %v506_v6, %v502_v7 }
 0x3f3   : > { %v508_v9 = vmul.f32 %v910_v32, %v507_v8 }
 0x3f5   : > { %599 = vmatpush.msrb.mxu3 %v508_v9 }
 0x3f6   : > { %825 = vmatmul.msk.f32.vlgmr.msrb.gmra.mxu3 %vm374_vm15, %v452_v0 }
 0x3f9   : > { %v558_v10 = vpop.permute.xlu1 %557 }
 0x3fa   : > { %824 = vmatmul.msk.f32.vlgmr.msrb.gmra.mxu2 %vm374_vm15, %v558_v10 }
 0x461   : > { %v540_v11 = vpop.xlane.xlu1 %539 }
 0x462   : > { %v541_v12 = vsub.f32 %v452_v0, %v540_v11 }
 0x464   : > { %v542_v13 = vmul.f32 1.442695, %v541_v12 }
 0x466   : > { %917 = vpow2.f32 %v542_v13 }
 0x46c   : > { %v918_v14 = vpop.eup %917 }
 0x46d   : > { %v544_v15 = vsel %vm374_vm15, %v918_v14, 0.0 }
 0x46e   : > { %545 = vadd.xlane.f32.xlu0 %v544_v15 }
 0x476   : > { %552 = vadd.xlane.f32.xlu0 %v551_v19 }
 0x479   : > { %v601_v21 = vpop.f32.mrf.mxu3 }
 0x47d   : > { %v578_v20 = vpop.f32.mrf.mxu2 }
 0x47e   : > { %622 = vmatpush.msra.mxu2 %v578_v20 }
 0x47f   : > { %826 = vmatmul.msk.f32.vlgmr.msra.gmra.mxu2 %vm374_vm15, %v601_v21 }
 0x4e1   : > { %v546_v34 = vpop.xlane.xlu0 %545 }
 0x4e9   : > { %v553_v42 = vpop.xlane.xlu0 %552 }
 0x502   : > { %v624_v22 = vpop.f32.mrf.mxu2 }
 0x503   : > { %v627_v23 = vsel %vm374_vm15, %v624_v22, -inf  ;;  %v639_v31 = vmul.f32 %v822_v17, %v624_v22 }
 0x504   : > { %628 = vmax.xlane.f32.xlu1 %v627_v23 }
 0x505   : > { %v640_v32 = vsel %vm374_vm15, %v639_v31, 0.0 }
 0x51d   : > { %385 = vrot.lane.b32.xlu1 %v383_v25, %s1025_s12 }
 0x577   : > { %v629_v26 = vpop.xlane.xlu1 %628 }
 0x578   : > { %v630_v27 = vsub.f32 %v624_v22, %v629_v26 }
 0x57a   : > { %v631_v28 = vmul.f32 1.442695, %v630_v27 }
 0x57c   : > { %919 = vpow2.f32 %v631_v28 }
 0x57d   : > { %921 = vlog2.f32 %v546_v34 }
 0x582   : > { %v920_v29 = vpop.eup %919 }
 0x583   : > { %v633_v30 = vsel %vm374_vm15, %v920_v29, 0.0  ;;  %v922_v36 = vpop.eup %921 }
 0x584   : > { %634 = vadd.xlane.f32.xlu2 %v633_v30  ;;  %v548_v37 = vmul.f32 0.6931472, %v922_v36 }
 0x586   : > { %v549_v39 = vadd.f32 %v548_v37, %v540_v11 }
 0x588   : > { %v554_v44 = vsub.f32 %v549_v39, %v553_v42 }
 0x58c   : > { %641 = vadd.xlane.f32.xlu2 %v640_v32 }
 0x58f   : > { %v386_v33 = vpop.permute.xlu1 %385 }
 0x590   : > { %821 = vst.msk [vmem:[%s1164_s11 + $0x10] sm:$0xff] %vm374_vm15, %v386_v33 }
 0x5f7   : > { %v635_v35 = vpop.xlane.xlu2 %634 }
 0x5f8   : > { %923 = vlog2.f32 %v635_v35 }
 0x5fe   : > { %v924_v38 = vpop.eup %923 }
 0x5ff   : > { %v637_v40 = vmul.f32 0.6931472, %v924_v38  ;;  %v642_v43 = vpop.xlane.xlu2 %641 }
 0x601   : > { %v638_v41 = vadd.f32 %v637_v40, %v629_v26 }
 0x603   : > { %v643_v45 = vsub.f32 %v638_v41, %v642_v43 }
 0x605   : > { %v644_v46 = vadd.f32 %v643_v45, %v554_v44 }
 0x607   : > { %645 = vxpose.xlu0.b32.start.end [1/1] (short) (narrow) %v644_v46, 8 }
 0x608   : > { %952 = shalt.err (!%p949_p3)
}
 0x609   : > { %s1026_s11 = smov 128   ;;  %s1027_s12 = smov 8   ;;  %vm677_vm13 = vcmask 57344  }
 0x60a   : > { %845 = dma.vmem_to_hbm [thread:$0]  (%p1091_p5), %s697_s13, 384, %s699_s27, %s680_s28, %s1026_s11, %s1026_s11, %s1027_s12  }
 0x60b   : > { %s710_s22 = scalar_lea.hbm %s1243_s4, %s1074_s19  ;;  %s200_s23 = scalar_lea.vmem [#allocation4], %s1161_s9 }
 0x60c   : > { %s712_s5 = sshll.u32 %s200_s23, 4  ;;  %s714_s29 = sshll.u32 %s710_s22, 4  ;;  %s713_s5 = int_to_ptr.vmem [resolvable:$true] %s712_s5  ;;  %s715_s29 = int_to_ptr.hbm [resolvable:$true] %s714_s29 }
 0x60d   : > { %s685_s30 = scalar_lea.sflag [#allocation5], %s1161_s9  ;;  %s967_s6 = sshra.s32 %s715_s29, 4  ;;  %s968_s6 = int_to_ptr.hbm [resolvable:$true] %s967_s6 }
 0x60e   : > { %s969_s7 = scalar_lea.hbm %s968_s6, 1  ;;  %s973_s19 = scalar_lea.hbm %s1243_s4, 2 }
 0x60f   : > { %p970_p4 = scmp.ne.s32.totalorder %s968_s6, %s969_s7  ;;  %p974_p9 = scmp.lt.s32.totalorder %s968_s6, %s1243_s4 }
 0x610   : > { %p975_p10 = scmp.lt.s32.totalorder %s973_s19, %s969_s7 }
 0x611   : > { %p971_p7 = pnand %p970_p4, %p1091_p5 }
 0x612   : > { %p976_p11 = por %p975_p10, %p974_p9 }
 0x613   : > { %p972_p8 = pneg %p971_p7 }
 0x615   : > { %p977_p12 = pnand %p976_p11, %p972_p8 }
 0x6ab   : > { %v661_v47 = vpop.trf.xlu0 }
 0x6ac   : > { %678 = vst.msk [vmem:[%s200_s23] sm:$0x1] %vm677_vm13, %v661_v47 }
 0x6ad   : > { %980 = shalt.err (!%p977_p12)
}
 0x6ae   : > { %846 = dma.vmem_to_hbm [thread:$0]  (%p1091_p5), %s713_s5, 16, %s715_s29, %s685_s30  }
 0x6af PF: > { %p856_p13 = scmp.ge.s32.totalorder %s1019_s18, 2  ;;  %s726_s9 = sand.u32 1, %s1007_s15  }
 0x6b0   : > { %s727_s10 = scalar_lea.sflag [#allocation3], %s726_s9 }
 0x6b1   : > { %p850_p0 = pnand %p856_p13, %p1095_p6 }
 0x6b3   : > { %p851_p1 = pneg %p850_p0 }
 0x6b5   : > { %998 = dma.done.wait (%p851_p1), %s727_s10, 384  }
 0x6b6   : > { %1000 = vsyncadd (%p851_p1), %s727_s10, 4294966912  ;;  %s737_s11 = scalar_lea.sflag [#allocation5], %s726_s9 }
 0x6b7   : > { %1002 = dma.done.wait (%p851_p1), %s737_s11, 16  }
 0x6b8   : > { %1004 = vsyncadd (%p851_p1), %s737_s11, 4294967280  ;;  %p18_p5 = scmp.ge.s32.totalorder %s1078_s21, 4   ;;  %s1246_s15 = smov %s1011_s16 }
 0x6b9   : > { %s1247_s16 = smov %s1015_s17  ;;  %s1248_s17 = smov %s1089_s24 }
 0x6ba   : > { %s1249_s18 = smov %s1078_s21  ;;  %20 = sbr.rel (!%p18_p5) target bundleno = 5 (0x5), region = 86 }
 0x6bf   :  { %742 = vsyncpa [#allocation3], 1 }
 0x6c0   :  { %744 = vsyncpa [#allocation3 + $0x1], 1 }
 0x6c1   :  { %745 = vsyncpa [#allocation5], 1 }
 0x6c2   :  { %747 = vsyncpa [#allocation5 + $0x1], 1 }

</bundles_post_ra>
